<compile_context>
chip_gen: v6e
topology: v6e:2x2x1
jax: 0.10.0
libtpu: 0.0.40
codegen_flags: <defaults>
</compile_context>

<pallas_src>
import functools

import numpy as np
import jax
import jax.numpy as jnp
from jax.experimental import pallas as pl
from jax.experimental.pallas import tpu as pltpu


_NEG_BIG = -1e30        # online-max init (finite, avoids -inf arithmetic)
_DENOM_FLOOR = 1e-30    # guards empty / fully-underflowed group columns


def _round_up(v, m):
    return -(-v // m) * m


def _vmem_cap_bytes():
    try:
        return int(0.85 * pltpu.get_tpu_info().vmem_capacity_bytes)
    except Exception:
        return int(0.85 * (64 << 20))     # conservative fallback = v7x physical


def _vmem_limit(block_bytes, interm_bytes):
    # double-buffered pipelined blocks + in-body f32 intermediates + headroom,
    # never above 85% of this generation's physical VMEM.
    want = 2 * block_bytes + interm_bytes + (4 << 20)
    return int(min(max(want, 32 << 20), _vmem_cap_bytes()))


# ---------------------------------------------------------------------------
# Kernel 1: fused g/f projection + online-max scatter softmax/sum + h(y).
# ---------------------------------------------------------------------------
def _softagg_group_kernel(x_ref, wgf_ref, bgf_ref, whT_ref, bh_ref, mt_ref,
                          hy_ref, m_sc, denom_sc, num_sc, *, dim):
    """One row tile of the flattened (B*N) rows.

    x_ref:   (TR, D)   bf16 input rows
    wgf_ref: (D, 2D)   bf16 [Wg^T | Wf^T]
    bgf_ref: (1, 2D)   f32  [bg | bf]
    whT_ref: (D, D)    bf16 Wh^T
    bh_ref:  (1, D)    f32  bh
    mt_ref:  (GT, TR)  bf16 one-hot membership, pre-transposed
    hy_ref:  (GT, D)   h(y) output (written at the last tile only)
    scratch: m_sc (1,D) running column max, denom_sc/num_sc (GT,D) f32 acc.
    """
    D = dim
    t = pl.program_id(0)

    @pl.when(t == 0)
    def _():
        m_sc[...] = jnp.full(m_sc.shape, _NEG_BIG, jnp.float32)
        denom_sc[...] = jnp.zeros(denom_sc.shape, jnp.float32)
        num_sc[...] = jnp.zeros(num_sc.shape, jnp.float32)

    # fused g/f projection on the MXU: (TR, D) @ (D, 2D), f32 accumulation
    gf = jnp.dot(x_ref[...], wgf_ref[...],
                 preferred_element_type=jnp.float32) + bgf_ref[...]
    gx = gf[:, :D]
    fx = gf[:, D:]

    # flash-style online column max (constant within every group per column,
    # so the softmax is mathematically unchanged by this shift).
    tile_max = jnp.max(gx, axis=0, keepdims=True)           # (1, D)
    m_new = jnp.maximum(m_sc[...], tile_max)
    alpha = jnp.exp(m_sc[...] - m_new)                       # (1, D) rescale
    e = jnp.exp(gx - m_new)                                  # (TR, D) f32, EUP

    # group-level scatter sums: bf16 MXU matmuls, f32 accumulation.
    mt = mt_ref[...]                                         # (GT, TR)
    d_tile = jnp.dot(mt, e.astype(jnp.bfloat16),
                     preferred_element_type=jnp.float32)     # (GT, D)
    n_tile = jnp.dot(mt, (fx * e).astype(jnp.bfloat16),
                     preferred_element_type=jnp.float32)     # (GT, D)

    denom_sc[...] = alpha * denom_sc[...] + d_tile
    num_sc[...] = alpha * num_sc[...] + n_tile
    m_sc[...] = m_new

    @pl.when(t == pl.num_programs(0) - 1)
    def _():
        # normalization folded at group level: y = num / denom (per group).
        inv = pl.reciprocal(jnp.maximum(denom_sc[...], _DENOM_FLOOR),
                            approx=True)                     # (GT, D), EUP
        y = (num_sc[...] * inv).astype(jnp.bfloat16)
        hy = jnp.dot(y, whT_ref[...],
                     preferred_element_type=jnp.float32) + bh_ref[...]
        hy_ref[...] = hy.astype(hy_ref.dtype)


# ---------------------------------------------------------------------------
# Kernel 2 (expand=True only): exact one-hot gather h(y)[:, jx] per row tile.
# ---------------------------------------------------------------------------
def _expand_gather_kernel(m_ref, hy_ref, out_ref):
    m = m_ref[...].astype(jnp.float32)          # exact upcast of one-hot rows
    hy = hy_ref[...].astype(jnp.float32)
    out_ref[...] = jnp.dot(m, hy,
                           preferred_element_type=jnp.float32).astype(out_ref.dtype)


# ---------------------------------------------------------------------------
# Host-side glue (cached): unique/inverse + padded block-diagonal membership.
# ---------------------------------------------------------------------------
@functools.lru_cache(maxsize=64)
def _group_structure(ix_bytes, ix_dtype_str, n, batch, tile_rows):
    # TODO(synk): torch.unique(ix, return_inverse=True) is data dependent and
    # stays on the host; the wrapper cannot be jitted over ix (results cached).
    ix = np.frombuffer(ix_bytes, dtype=np.dtype(ix_dtype_str)).reshape(-1)[:n]
    _, jx = np.unique(ix, return_inverse=True)
    jx = jx.astype(np.int64)
    G = int(jx.max()) + 1

    R = batch * n
    if R <= tile_rows:
        TR = _round_up(R, 16)          # single tile: pad rows to bf16 sublane quantum
        R_pad = TR
    else:
        TR = tile_rows                 # multi tile: lane-aligned (128-mult) row tiles
        R_pad = _round_up(R, TR)
    T = R_pad // TR

    GT = _round_up(max(batch * G, 1), 16)   # padded flattened group count

    rows = np.arange(R)
    cols = np.repeat(np.arange(batch) * G, n) + np.tile(jx, batch)
    M = np.zeros((R_pad, GT), np.float32)   # block-diagonal one-hot (exact in bf16)
    M[rows, cols] = 1.0

    M_bf = jnp.asarray(M, dtype=jnp.bfloat16)                              # (R_pad, GT)
    MT_bf = jnp.asarray(np.ascontiguousarray(M.T), dtype=jnp.bfloat16)     # (GT, R_pad)
    return G, GT, R_pad, TR, T, M_bf, MT_bf


def softagg_pallas(x, ix, Wf, bf, Wg, bg, Wh, bh, expand=True,
                   out_dtype=jnp.float32, tile_rows=512):
    """JAX/Pallas equivalent of SoftAgg.forward(x, ix)."""
    assert tile_rows % 128 == 0, "row tile must be a multiple of 128 lanes"
    x = jnp.asarray(x, jnp.float32)
    B, N, D = x.shape

    ix_np = np.asarray(ix)
    G, GT, R_pad, TR, T, M_bf, MT_bf = _group_structure(
        ix_np.tobytes(), str(ix_np.dtype), int(N), int(B), int(tile_rows))

    # fused [g|f] weights, transposed once so the kernel does plain x @ W^T.
    WgfT = jnp.concatenate([jnp.asarray(Wg, jnp.float32).T,
                            jnp.asarray(Wf, jnp.float32).T],
                           axis=1).astype(jnp.bfloat16)                # (D, 2D)
    bgf = jnp.concatenate([jnp.asarray(bg, jnp.float32),
                           jnp.asarray(bf, jnp.float32)]).reshape(1, 2 * D)
    WhT = jnp.asarray(Wh, jnp.float32).T.astype(jnp.bfloat16)          # (D, D)
    bh2 = jnp.asarray(bh, jnp.float32).reshape(1, D)

    # flatten (B, N) -> rows for MXU row fill; zero-pad to the row-tile grid.
    R = B * N
    x_flat = x.reshape(R, D)
    if R_pad > R:
        x_flat = jnp.pad(x_flat, ((0, R_pad - R), (0, 0)))
    x_bf = x_flat.astype(jnp.bfloat16)

    f32b, bf16b = 4, 2
    outb = jnp.dtype(out_dtype).itemsize

    # ---- kernel 1: grouped aggregation -> h(y) over (padded) groups ---------
    blocks1 = (TR * D * bf16b + GT * TR * bf16b + 2 * D * D * bf16b
               + 2 * D * f32b + D * D * bf16b + D * f32b + GT * D * outb)
    interm1 = (1 + 2 * GT) * D * f32b + 7 * TR * D * f32b
    ce1 = pl.CostEstimate(
        flops=int(4 * R_pad * D * D + 4 * R_pad * GT * D + 2 * GT * D * D),
        transcendentals=int(R_pad * D + 2 * T * D),
        bytes_accessed=int(R_pad * D * bf16b + GT * R_pad * bf16b
                           + 3 * D * D * bf16b + 3 * D * f32b + GT * D * outb))

    hy = pl.pallas_call(
        functools.partial(_softagg_group_kernel, dim=D),
        out_shape=jax.ShapeDtypeStruct((GT, D), out_dtype),
        grid=(T,),
        in_specs=[
            pl.BlockSpec((TR, D), lambda t: (t, 0)),        # x row tile
            pl.BlockSpec((D, 2 * D), lambda t: (0, 0)),     # [Wg|Wf]^T (resident)
            pl.BlockSpec((1, 2 * D), lambda t: (0, 0)),     # [bg|bf]
            pl.BlockSpec((D, D), lambda t: (0, 0)),         # Wh^T
            pl.BlockSpec((1, D), lambda t: (0, 0)),         # bh
            pl.BlockSpec((GT, TR), lambda t: (0, t)),       # M^T tile (pre-transposed)
        ],
        out_specs=pl.BlockSpec((GT, D), lambda t: (0, 0)),
        scratch_shapes=[pltpu.VMEM((1, D), jnp.float32),    # running column max
                        pltpu.VMEM((GT, D), jnp.float32),   # denom accumulator
                        pltpu.VMEM((GT, D), jnp.float32)],  # numerator accumulator
        compiler_params=pltpu.CompilerParams(
            dimension_semantics=("arbitrary",),
            vmem_limit_bytes=_vmem_limit(blocks1, interm1)),
        cost_estimate=ce1,
    )(x_bf, WgfT, bgf, WhT, bh2, MT_bf)

    if not expand:
        return hy[:B * G].reshape(B, G, D)

    # ---- kernel 2: expand gather h(y)[:, jx] (exact, "parallel" grid) -------
    blocks2 = TR * GT * bf16b + GT * D * outb + TR * D * outb
    interm2 = TR * GT * f32b + GT * D * f32b + TR * D * f32b
    ce2 = pl.CostEstimate(
        flops=int(2 * R_pad * GT * D), transcendentals=0,
        bytes_accessed=int(R_pad * GT * bf16b + GT * D * outb + R_pad * D * outb))

    out = pl.pallas_call(
        _expand_gather_kernel,
        out_shape=jax.ShapeDtypeStruct((R_pad, D), out_dtype),
        grid=(T,),
        in_specs=[pl.BlockSpec((TR, GT), lambda t: (t, 0)),   # one-hot row tile
                  pl.BlockSpec((GT, D), lambda t: (0, 0))],   # h(y) (resident)
        out_specs=pl.BlockSpec((TR, D), lambda t: (t, 0)),
        compiler_params=pltpu.CompilerParams(
            dimension_semantics=("parallel",),
            vmem_limit_bytes=_vmem_limit(blocks2, interm2)),
        cost_estimate=ce2,
    )(M_bf, hy)

    return out[:R].reshape(B, N, D)


# ---------------------------------------------------------------------------
# Reference (matches the PyTorch module semantics)
# ---------------------------------------------------------------------------
def reference_softagg(x, ix, Wf, bf, Wg, bg, Wh, bh, expand=True):
    x = np.asarray(x, np.float64)
    _, jx = np.unique(np.asarray(ix), return_inverse=True)
    G = int(jx.max()) + 1
    B, N, D = x.shape
    fx = x @ np.asarray(Wf, np.float64).T + np.asarray(bf, np.float64)
    gx = x @ np.asarray(Wg, np.float64).T + np.asarray(bg, np.float64)
    y = np.zeros((B, G, D))
    for g in range(G):
        mask = (jx == g)
        sub = gx[:, mask, :]
        sub = sub - sub.max(axis=1, keepdims=True)
        e = np.exp(sub)
        w = e / e.sum(axis=1, keepdims=True)
        y[:, g, :] = (fx[:, mask, :] * w).sum(axis=1)
    hy = y @ np.asarray(Wh, np.float64).T + np.asarray(bh, np.float64)
    if expand:
        return hy[:, jx, :]
    return hy


if __name__ == "__main__":
    key = jax.random.PRNGKey(0)
    k1, k2, k3, k4, k5, k6, k7, k8 = jax.random.split(key, 8)

    D = 128  # module default is 512; kept small for the self-test
    Wf = jax.random.normal(k2, (D, D), jnp.float32) * 0.05
    bf = jax.random.normal(k3, (D,), jnp.float32) * 0.05
    Wg = jax.random.normal(k4, (D, D), jnp.float32) * 0.05
    bg = jax.random.normal(k5, (D,), jnp.float32) * 0.05
    Wh = jax.random.normal(k6, (D, D), jnp.float32) * 0.05
    bh = jax.random.normal(k7, (D,), jnp.float32) * 0.05

    # ---- test 1: B=2, N=16 (single row tile), both expand paths -------------
    B, N = 2, 16
    x = jax.random.normal(k1, (B, N, D), jnp.float32)
    ix = np.array([3, 3, 7, 7, 7, 1, 1, 3, 9, 9, 1, 7, 3, 9, 1, 1], np.int32)

    out = jax.block_until_ready(
        softagg_pallas(x, ix, Wf, bf, Wg, bg, Wh, bh, expand=True))
    ref = reference_softagg(np.asarray(x), ix, np.asarray(Wf), np.asarray(bf),
                            np.asarray(Wg), np.asarray(bg),
                            np.asarray(Wh), np.asarray(bh), expand=True)
    assert out.shape == (B, N, D), out.shape
    np.testing.assert_allclose(np.asarray(out), ref, rtol=2e-2, atol=5e-3)

    out_g = jax.block_until_ready(
        softagg_pallas(x, ix, Wf, bf, Wg, bg, Wh, bh, expand=False))
    ref_g = reference_softagg(np.asarray(x), ix, np.asarray(Wf), np.asarray(bf),
                              np.asarray(Wg), np.asarray(bg),
                              np.asarray(Wh), np.asarray(bh), expand=False)
    assert out_g.shape == ref_g.shape, (out_g.shape, ref_g.shape)
    np.testing.assert_allclose(np.asarray(out_g), ref_g, rtol=2e-2, atol=5e-3)

    # ---- test 2: B=1, N=200, tile_rows=128 -> multi-tile online accumulation
    B2, N2 = 1, 200
    x2 = jax.random.normal(k8, (B2, N2, D), jnp.float32)
    ix2 = np.asarray((np.arange(N2) * 7) % 5, np.int32)   # 5 groups
    out2 = jax.block_until_ready(
        softagg_pallas(x2, ix2, Wf, bf, Wg, bg, Wh, bh, expand=True,
                       tile_rows=128))
    ref2 = reference_softagg(np.asarray(x2), ix2, np.asarray(Wf), np.asarray(bf),
                             np.asarray(Wg), np.asarray(bg),
                             np.asarray(Wh), np.asarray(bh), expand=True)
    assert out2.shape == (B2, N2, D), out2.shape
    np.testing.assert_allclose(np.asarray(out2), ref2, rtol=2e-2, atol=5e-3)

    print("KERNEL_OK")
</pallas_src>

<mosaic_0001>
module attributes {stable_mosaic.version = 11 : i64} {
  func.func @_softagg_group_kernel(%arg0: i32, %arg1: memref<32x128xbf16, #tpu.memory_space<vmem>>, %arg2: memref<128x256xbf16, #tpu.memory_space<vmem>>, %arg3: memref<1x256xf32, #tpu.memory_space<vmem>>, %arg4: memref<128x128xbf16, #tpu.memory_space<vmem>>, %arg5: memref<1x128xf32, #tpu.memory_space<vmem>>, %arg6: memref<16x32xbf16, #tpu.memory_space<vmem>>, %arg7: memref<16x128xf32, #tpu.memory_space<vmem>>, %arg8: memref<1x128xf32, #tpu.memory_space<vmem>>, %arg9: memref<16x128xf32, #tpu.memory_space<vmem>>, %arg10: memref<16x128xf32, #tpu.memory_space<vmem>>) attributes {dimension_semantics = [#tpu.dimension_semantics<arbitrary>], iteration_bounds = array<i64: 1>, scalar_prefetch = 0 : i64, scratch_operands = 3 : i64, tpu.core_type = #tpu.core_type<tc>, window_params = [{transform_indices = @transform_0, window_bounds = array<i64: 32, 128>}, {pipeline_mode = #tpu.pipeline_mode<synchronous>, transform_indices = @transform_1, window_bounds = array<i64: 128, 256>}, {pipeline_mode = #tpu.pipeline_mode<synchronous>, transform_indices = @transform_2, window_bounds = array<i64: 1, 256>}, {pipeline_mode = #tpu.pipeline_mode<synchronous>, transform_indices = @transform_3, window_bounds = array<i64: 128, 128>}, {pipeline_mode = #tpu.pipeline_mode<synchronous>, transform_indices = @transform_4, window_bounds = array<i64: 1, 128>}, {transform_indices = @transform_5, window_bounds = array<i64: 16, 32>}, {pipeline_mode = #tpu.pipeline_mode<synchronous>, transform_indices = @transform_6, window_bounds = array<i64: 16, 128>}]} {
    %c0_i32 = arith.constant 0 : i32
    %0 = arith.cmpi eq, %arg0, %c0_i32 : i32
    %1 = arith.extui %0 : i1 to i32
    %c0_i32_0 = arith.constant 0 : i32
    %2 = arith.cmpi ne, %1, %c0_i32_0 : i32
    scf.if %2 {
      %cst_27 = arith.constant -1.000000e+30 : f32
      %41 = vector.broadcast %cst_27 : f32 to vector<1x128xf32>
      %c0_28 = arith.constant 0 : index
      %c0_29 = arith.constant 0 : index
      %42 = vector.load %arg8[%c0_28, %c0_29] : memref<1x128xf32, #tpu.memory_space<vmem>>, vector<1x128xf32>
      tpu.vector_store %arg8[%c0_28, %c0_29], %41 {strides = array<i32>} : memref<1x128xf32, #tpu.memory_space<vmem>>, vector<1x128xf32>,
      %cst_30 = arith.constant 0.000000e+00 : f32
      %43 = vector.broadcast %cst_30 : f32 to vector<16x128xf32>
      %c0_31 = arith.constant 0 : index
      %c0_32 = arith.constant 0 : index
      %44 = vector.load %arg9[%c0_31, %c0_32] : memref<16x128xf32, #tpu.memory_space<vmem>>, vector<16x128xf32>
      tpu.vector_store %arg9[%c0_31, %c0_32], %43 {strides = array<i32>} : memref<16x128xf32, #tpu.memory_space<vmem>>, vector<16x128xf32>,
      %cst_33 = arith.constant 0.000000e+00 : f32
      %45 = vector.broadcast %cst_33 : f32 to vector<16x128xf32>
      %c0_34 = arith.constant 0 : index
      %c0_35 = arith.constant 0 : index
      %46 = vector.load %arg10[%c0_34, %c0_35] : memref<16x128xf32, #tpu.memory_space<vmem>>, vector<16x128xf32>
      tpu.vector_store %arg10[%c0_34, %c0_35], %45 {strides = array<i32>} : memref<16x128xf32, #tpu.memory_space<vmem>>, vector<16x128xf32>,
    } else {
    }
    %c0 = arith.constant 0 : index
    %c0_1 = arith.constant 0 : index
    %3 = vector.load %arg1[%c0, %c0_1] : memref<32x128xbf16, #tpu.memory_space<vmem>>, vector<32x128xbf16>
    %c0_2 = arith.constant 0 : index
    %c0_3 = arith.constant 0 : index
    %4 = vector.load %arg2[%c0_2, %c0_3] : memref<128x256xbf16, #tpu.memory_space<vmem>>, vector<128x256xbf16>
    %cst = arith.constant dense<0.000000e+00> : vector<32x256xf32>
    %5 = tpu.matmul %3, %4, %cst {dimension_numbers = #tpu.dot_dimension_numbers<[1], [0], [0], [1], [0, 0, 1, 1], [], []>} : vector<32x128xbf16>, vector<128x256xbf16>, vector<32x256xf32> -> vector<32x256xf32>
    %c0_4 = arith.constant 0 : index
    %c0_5 = arith.constant 0 : index
    %6 = vector.load %arg3[%c0_4, %c0_5] : memref<1x256xf32, #tpu.memory_space<vmem>>, vector<1x256xf32>
    %7 = vector.broadcast %6 : vector<1x256xf32> to vector<32x256xf32>
    %8 = arith.addf %5, %7 : vector<32x256xf32>
    %9 = vector.extract_strided_slice %8 {offsets = [0, 0], sizes = [32, 128], strides = [1, 1]} : vector<32x256xf32> to vector<32x128xf32>
    %10 = vector.extract_strided_slice %8 {offsets = [0, 128], sizes = [32, 128], strides = [1, 1]} : vector<32x256xf32> to vector<32x128xf32>
    %cst_6 = arith.constant dense<0xFF800000> : vector<128xf32>
    %11 = vector.multi_reduction <maximumf>, %9, %cst_6 [0] : vector<32x128xf32> to vector<128xf32>
    %12 = vector.shape_cast %11 : vector<128xf32> to vector<1x128xf32>
    %c0_7 = arith.constant 0 : index
    %c0_8 = arith.constant 0 : index
    %13 = vector.load %arg8[%c0_7, %c0_8] : memref<1x128xf32, #tpu.memory_space<vmem>>, vector<1x128xf32>
    %14 = arith.maximumf %13, %12 : vector<1x128xf32>
    %c0_9 = arith.constant 0 : index
    %c0_10 = arith.constant 0 : index
    %15 = vector.load %arg8[%c0_9, %c0_10] : memref<1x128xf32, #tpu.memory_space<vmem>>, vector<1x128xf32>
    %16 = arith.subf %15, %14 : vector<1x128xf32>
    %17 = math.exp %16 : vector<1x128xf32>
    %18 = vector.broadcast %14 : vector<1x128xf32> to vector<32x128xf32>
    %19 = arith.subf %9, %18 : vector<32x128xf32>
    %20 = math.exp %19 : vector<32x128xf32>
    %c0_11 = arith.constant 0 : index
    %c0_12 = arith.constant 0 : index
    %21 = vector.load %arg6[%c0_11, %c0_12] : memref<16x32xbf16, #tpu.memory_space<vmem>>, vector<16x32xbf16>
    %22 = arith.truncf %20 : vector<32x128xf32> to vector<32x128xbf16>
    %cst_13 = arith.constant dense<0.000000e+00> : vector<16x128xf32>
    %23 = tpu.matmul %21, %22, %cst_13 {dimension_numbers = #tpu.dot_dimension_numbers<[1], [0], [0], [1], [0, 0, 1, 1], [], []>} : vector<16x32xbf16>, vector<32x128xbf16>, vector<16x128xf32> -> vector<16x128xf32>
    %24 = arith.mulf %10, %20 : vector<32x128xf32>
    %25 = arith.truncf %24 : vector<32x128xf32> to vector<32x128xbf16>
    %cst_14 = arith.constant dense<0.000000e+00> : vector<16x128xf32>
    %26 = tpu.matmul %21, %25, %cst_14 {dimension_numbers = #tpu.dot_dimension_numbers<[1], [0], [0], [1], [0, 0, 1, 1], [], []>} : vector<16x32xbf16>, vector<32x128xbf16>, vector<16x128xf32> -> vector<16x128xf32>
    %c0_15 = arith.constant 0 : index
    %c0_16 = arith.constant 0 : index
    %27 = vector.load %arg9[%c0_15, %c0_16] : memref<16x128xf32, #tpu.memory_space<vmem>>, vector<16x128xf32>
    %28 = vector.broadcast %17 : vector<1x128xf32> to vector<16x128xf32>
    %29 = arith.mulf %28, %27 : vector<16x128xf32>
    %30 = arith.addf %29, %23 : vector<16x128xf32>
    %c0_17 = arith.constant 0 : index
    %c0_18 = arith.constant 0 : index
    %31 = vector.load %arg9[%c0_17, %c0_18] : memref<16x128xf32, #tpu.memory_space<vmem>>, vector<16x128xf32>
    tpu.vector_store %arg9[%c0_17, %c0_18], %30 {strides = array<i32>} : memref<16x128xf32, #tpu.memory_space<vmem>>, vector<16x128xf32>,
    %c0_19 = arith.constant 0 : index
    %c0_20 = arith.constant 0 : index
    %32 = vector.load %arg10[%c0_19, %c0_20] : memref<16x128xf32, #tpu.memory_space<vmem>>, vector<16x128xf32>
    %33 = vector.broadcast %17 : vector<1x128xf32> to vector<16x128xf32>
    %34 = arith.mulf %33, %32 : vector<16x128xf32>
    %35 = arith.addf %34, %26 : vector<16x128xf32>
    %c0_21 = arith.constant 0 : index
    %c0_22 = arith.constant 0 : index
    %36 = vector.load %arg10[%c0_21, %c0_22] : memref<16x128xf32, #tpu.memory_space<vmem>>, vector<16x128xf32>
    tpu.vector_store %arg10[%c0_21, %c0_22], %35 {strides = array<i32>} : memref<16x128xf32, #tpu.memory_space<vmem>>, vector<16x128xf32>,
    %c0_23 = arith.constant 0 : index
    %c0_24 = arith.constant 0 : index
    %37 = vector.load %arg8[%c0_23, %c0_24] : memref<1x128xf32, #tpu.memory_space<vmem>>, vector<1x128xf32>
    tpu.vector_store %arg8[%c0_23, %c0_24], %14 {strides = array<i32>} : memref<1x128xf32, #tpu.memory_space<vmem>>, vector<1x128xf32>,
    %c0_i32_25 = arith.constant 0 : i32
    %38 = arith.cmpi eq, %arg0, %c0_i32_25 : i32
    %39 = arith.extui %38 : i1 to i32
    %c0_i32_26 = arith.constant 0 : i32
    %40 = arith.cmpi ne, %39, %c0_i32_26 : i32
    scf.if %40 {
      %c0_27 = arith.constant 0 : index
      %c0_28 = arith.constant 0 : index
      %41 = vector.load %arg9[%c0_27, %c0_28] : memref<16x128xf32, #tpu.memory_space<vmem>>, vector<16x128xf32>
      %cst_29 = arith.constant 1.000000e-30 : f32
      %42 = vector.broadcast %cst_29 : f32 to vector<16x128xf32>
      %43 = arith.maximumf %41, %42 : vector<16x128xf32>
      %44 = tpu.reciprocal %43 {approx = true} : vector<16x128xf32> -> vector<16x128xf32>
      %c0_30 = arith.constant 0 : index
      %c0_31 = arith.constant 0 : index
      %45 = vector.load %arg10[%c0_30, %c0_31] : memref<16x128xf32, #tpu.memory_space<vmem>>, vector<16x128xf32>
      %46 = arith.mulf %45, %44 : vector<16x128xf32>
      %47 = arith.truncf %46 : vector<16x128xf32> to vector<16x128xbf16>
      %c0_32 = arith.constant 0 : index
      %c0_33 = arith.constant 0 : index
      %48 = vector.load %arg4[%c0_32, %c0_33] : memref<128x128xbf16, #tpu.memory_space<vmem>>, vector<128x128xbf16>
      %cst_34 = arith.constant dense<0.000000e+00> : vector<16x128xf32>
      %49 = tpu.matmul %47, %48, %cst_34 {dimension_numbers = #tpu.dot_dimension_numbers<[1], [0], [0], [1], [0, 0, 1, 1], [], []>} : vector<16x128xbf16>, vector<128x128xbf16>, vector<16x128xf32> -> vector<16x128xf32>
      %c0_35 = arith.constant 0 : index
      %c0_36 = arith.constant 0 : index
      %50 = vector.load %arg5[%c0_35, %c0_36] : memref<1x128xf32, #tpu.memory_space<vmem>>, vector<1x128xf32>
      %51 = vector.broadcast %50 : vector<1x128xf32> to vector<16x128xf32>
      %52 = arith.addf %49, %51 : vector<16x128xf32>
      %c0_37 = arith.constant 0 : index
      %c0_38 = arith.constant 0 : index
      %53 = vector.load %arg7[%c0_37, %c0_38] : memref<16x128xf32, #tpu.memory_space<vmem>>, vector<16x128xf32>
      tpu.vector_store %arg7[%c0_37, %c0_38], %52 {strides = array<i32>} : memref<16x128xf32, #tpu.memory_space<vmem>>, vector<16x128xf32>,
    } else {
    }
    return
  }
  func.func @transform_0(%arg0: i32) -> (i32, i32) {
    %c0_i32 = arith.constant 0 : i32
    %c0_i32_0 = arith.constant 0 : i32
    return %arg0, %c0_i32 : i32, i32
  }
  func.func @transform_1(%arg0: i32) -> (i32, i32) {
    %c0_i32 = arith.constant 0 : i32
    %c0_i32_0 = arith.constant 0 : i32
    %c0_i32_1 = arith.constant 0 : i32
    return %c0_i32, %c0_i32_0 : i32, i32
  }
  func.func @transform_2(%arg0: i32) -> (i32, i32) {
    %c0_i32 = arith.constant 0 : i32
    %c0_i32_0 = arith.constant 0 : i32
    %c0_i32_1 = arith.constant 0 : i32
    return %c0_i32, %c0_i32_0 : i32, i32
  }
  func.func @transform_3(%arg0: i32) -> (i32, i32) {
    %c0_i32 = arith.constant 0 : i32
    %c0_i32_0 = arith.constant 0 : i32
    %c0_i32_1 = arith.constant 0 : i32
    return %c0_i32, %c0_i32_0 : i32, i32
  }
  func.func @transform_4(%arg0: i32) -> (i32, i32) {
    %c0_i32 = arith.constant 0 : i32
    %c0_i32_0 = arith.constant 0 : i32
    %c0_i32_1 = arith.constant 0 : i32
    return %c0_i32, %c0_i32_0 : i32, i32
  }
  func.func @transform_5(%arg0: i32) -> (i32, i32) {
    %c0_i32 = arith.constant 0 : i32
    %c0_i32_0 = arith.constant 0 : i32
    return %c0_i32, %arg0 : i32, i32
  }
  func.func @transform_6(%arg0: i32) -> (i32, i32) {
    %c0_i32 = arith.constant 0 : i32
    %c0_i32_0 = arith.constant 0 : i32
    %c0_i32_1 = arith.constant 0 : i32
    return %c0_i32, %c0_i32_0 : i32, i32
  }
}

</mosaic_0001>

<bundles_post_ra>
// kernel: tpu_custom_call.1
= control target key start
LH: loop header
LB: loop body
LE: loop exit
PB: predicated region body
PF: predicated region fallthrough
CT: control target
= control target key end

     0   :  { %11 = vsyncpa [#allocation6], 0  ;;  %s928_s0 = inlined_call_operand.hbm [shape: bf16[32,128], index: 0, kind: input, shape index: {}]   ;;  %s929_s1 = inlined_call_operand.hbm [shape: bf16[128,256], index: 1, kind: input, shape index: {}]   ;;  %s930_s2 = inlined_call_operand.hbm [shape: f32[1,256], index: 2, kind: input, shape index: {}]   ;;  %s931_s3 = inlined_call_operand.hbm [shape: bf16[128,128], index: 3, kind: input, shape index: {}]   ;;  %s932_s4 = inlined_call_operand.vmem [shape: f32[1,128], index: 4, kind: input, shape index: {}]   ;;  %s933_s5 = inlined_call_operand.vmem [shape: bf16[16,32], index: 5, kind: input, shape index: {}]   ;;  %s934_s6 = inlined_call_operand.hbm [shape: f32[16,128], index: 6, kind: output, shape index: {}]  }
   0x1   :  { %12 = vsyncpa [#allocation9], 0 }
   0x2   :  { %13 = vsyncpa [#allocation12], 0 }
   0x3   :  { %14 = vsyncpa [#allocation7], 0  ;;  %s818_s21 = smov [#allocation8]  }
   0x4   :  { %s32_s22 = sshll.u32 %s818_s21, 4  ;;  %s33_s22 = int_to_ptr.vmem [resolvable:$true] %s32_s22 }
   0x5   :  { %s718_s23 = scalar_lea.vmem %s33_s22, 2048  ;;  %p723_p1 = scmp.lt.s32.totalorder %s33_s22, %s33_s22 }
   0x6   :  { %p719_p0 = scmp.ne.s32.totalorder %s33_s22, %s718_s23  ;;  %p724_p2 = scmp.lt.s32.totalorder %s718_s23, %s718_s23 }
   0x8   :  { %p725_p3 = por %p724_p2, %p723_p1 }
   0xa   :  { %p726_p4 = pnand %p725_p3, %p719_p0 }
   0xc   :  { %729 = shalt.err (!%p726_p4)
}
   0xd   :  { %s819_s24 = smov 128   ;;  %s820_s25 = smov 8  }
   0xe   :  { %38 = dma.hbm_to_vmem [thread:$0]  %s929_s1, 2048, %s33_s22, [#allocation9], %s819_s24, %s819_s24, %s820_s25  }
   0xf   :  { %s821_s28 = smov [#allocation5]  }
  0x10   :  { %s20_s29 = sshll.u32 %s821_s28, 4  ;;  %s21_s29 = int_to_ptr.vmem [resolvable:$true] %s20_s29 }
  0x11   :  { %s738_s30 = scalar_lea.vmem %s21_s29, 256  ;;  %p743_p6 = scmp.lt.s32.totalorder %s21_s29, %s21_s29 }
  0x12   :  { %p739_p5 = scmp.ne.s32.totalorder %s21_s29, %s738_s30  ;;  %p744_p7 = scmp.lt.s32.totalorder %s738_s30, %s738_s30 }
  0x14   :  { %p745_p8 = por %p744_p7, %p743_p6 }
  0x16   :  { %p746_p9 = pnand %p745_p8, %p739_p5 }
  0x18   :  { %749 = shalt.err (!%p746_p9)
}
  0x19   :  { %s822_s7 = smov 64   ;;  %s823_s8 = smov 4  }
  0x1a   :  { %26 = dma.hbm_to_vmem [thread:$0]  %s928_s0, 256, %s21_s29, [#allocation6], %s822_s7, %s822_s7, %s823_s8  }
  0x1b   :  { %s824_s11 = smov [#allocation10]   ;;  %s825_s13 = smov [#allocation11]  }
  0x1c   :  { %s45_s12 = sshll.u32 %s824_s11, 4  ;;  %s54_s1 = sshll.u32 %s825_s13, 4  ;;  %s46_s12 = int_to_ptr.vmem [resolvable:$true] %s45_s12  ;;  %s55_s1 = int_to_ptr.vmem [resolvable:$true] %s54_s1 }
  0x1d   :  { %s758_s14 = scalar_lea.vmem %s46_s12, 32  ;;  %p763_p11 = scmp.lt.s32.totalorder %s46_s12, %s46_s12 }
  0x1e   :  { %p759_p10 = scmp.ne.s32.totalorder %s46_s12, %s758_s14  ;;  %p764_p12 = scmp.lt.s32.totalorder %s758_s14, %s758_s14 }
  0x20   :  { %p765_p13 = por %p764_p12, %p763_p11 }
  0x22   :  { %p766_p0 = pnand %p765_p13, %p759_p10 }
  0x24   :  { %769 = shalt.err (!%p766_p0)
}
  0x25   :  { %48 = dma.hbm_to_vmem [thread:$0]  %s930_s2, 32, %s46_s12, [#allocation9]  }
  0x26   :  { %s778_s17 = scalar_lea.vmem %s55_s1, 1024  ;;  %p783_p2 = scmp.lt.s32.totalorder %s55_s1, %s55_s1 }
  0x27   :  { %p779_p1 = scmp.ne.s32.totalorder %s55_s1, %s778_s17  ;;  %p784_p3 = scmp.lt.s32.totalorder %s778_s17, %s778_s17 }
  0x29   :  { %p785_p4 = por %p784_p3, %p783_p2 }
  0x2b   :  { %p786_p5 = pnand %p785_p4, %p779_p1 }
  0x2d   :  { %789 = shalt.err (!%p786_p5)
}
  0x2e   :  { %60 = dma.hbm_to_vmem [thread:$0]  %s931_s3, 1024, %s55_s1, [#allocation12], %s822_s7, %s822_s7, %s823_s8  }
  0x2f   :  { %810 = dma.done.wait [#allocation6], 256  }
  0x30   :  { %811 = vsyncadd [#allocation6], 4294967040 }
  0x31   :  { %812 = dma.done.wait [#allocation9], 2080  }
  0x32   :  { %813 = vsyncadd [#allocation9], 4294965216 }
  0x33   :  { %814 = dma.done.wait [#allocation12], 1024  }
  0x34   :  { %815 = vsyncadd [#allocation12], 4294966272  ;;  %v826_v0 = vmov 0   ;;  %v661_v1 = vld [vmem:[#allocation8 + $0x74] ss:$8 sps:$4 sm:$0xff]   ;;  %v828_v20 = vmov 0.0   ;;  %v109_v21 = vlaneseq }
  0x35   :  { %243 = vmatprep.mubr.bf16.mxu0 %v826_v0  ;;  %v663_v2 = vld [vmem:[#allocation8 + $0x70] ss:$8 sps:$4 sm:$0xff]   ;;  %211 = vmatprep.subr.bf16.mxu0 %v661_v1  ;;  %v664_v3 = vld [vmem:[#allocation8 + $0x64] ss:$8 sps:$4 sm:$0xff]   ;;  %v666_v4 = vld [vmem:[#allocation8 + $0x60] ss:$8 sps:$4 sm:$0xff]  }
  0x36   :  { %212 = vmatpush1.bf16.msra.mxu0 %v663_v2  ;;  %v667_v5 = vld [vmem:[#allocation8 + $0x54] ss:$8 sps:$4 sm:$0xff]   ;;  %v669_v6 = vld [vmem:[#allocation8 + $0x50] ss:$8 sps:$4 sm:$0xff]   ;;  %v670_v7 = vld [vmem:[#allocation8 + $0x44] ss:$8 sps:$4 sm:$0xff]   ;;  %612 = vmatprep.subr.bf16.mxu1 %v828_v20 }
  0x37   :  { %213 = vmatprep.subr.bf16.mxu0 %v664_v3  ;;  %v672_v8 = vld [vmem:[#allocation8 + $0x40] ss:$8 sps:$4 sm:$0xff]   ;;  %v673_v9 = vld [vmem:[#allocation8 + $0x34] ss:$8 sps:$4 sm:$0xff]   ;;  %v675_v10 = vld [vmem:[#allocation8 + $0x30] ss:$8 sps:$4 sm:$0xff]  }
  0x38   :  { %v676_v11 = vld [vmem:[#allocation8 + $0x24] ss:$8 sps:$4 sm:$0xff]   ;;  %v678_v12 = vld [vmem:[#allocation8 + $0x20] ss:$8 sps:$4 sm:$0xff]   ;;  %v679_v13 = vld [vmem:[#allocation8 + $0x14] ss:$8 sps:$4 sm:$0xff]  }
  0x39   :  { %v681_v14 = vld [vmem:[#allocation8 + $0x10] ss:$8 sps:$4 sm:$0xff]   ;;  %v682_v15 = vld [vmem:[#allocation8 + $0x4] ss:$8 sps:$4 sm:$0xff]   ;;  %v684_v16 = vld [vmem:[#allocation8] ss:$8 sps:$4 sm:$0xff]  }
  0x3a   :  { %214 = vmatpush1.bf16.msra.mxu0 %v666_v4  ;;  %v685_v17 = vld [vmem:[#allocation5] sm:$0xff]   ;;  %v686_v18 = vld [vmem:[#allocation5 + $0x8] sm:$0xff]   ;;  %v827_v19 = vmov -1e+30   ;;  %vm829_vm0 = vmmov 0   ;;  %v110_v23 = vshrl.u32 %v109_v21, 7 }
  0x3b   :  { %215 = vmatprep.subr.bf16.mxu0 %v667_v5  ;;  %82 = vst [vmem:[#allocation2] sm:$0x1] %v827_v19  ;;  %616 = vmatprep.mubr.msk.bf16.mxu1 %vm829_vm0, %v828_v20  ;;  %v107_v27 = vld [vmem:[#allocation10] sm:$0x3]  ;;  %vm305_vm1 = vcmask 261120   ;;  %v693_v19 = vld [vmem:[#allocation11 + $0x10] sm:$0xff]  }
  0x3c   :  { %v884_v26 = vsub.s32 0, %v110_v23  ;;  %v115_v58 = vsub.s32 1, %v110_v23  ;;  %v694_v21 = vld [vmem:[#allocation11 + $0x8] sm:$0xff]   ;;  %s830_s20 = smov [#allocation13]  }
  0x3d   :  { %s553_s21 = sshll.u32 %s830_s20, 4  ;;  %s554_s21 = int_to_ptr.vmem [resolvable:$true] %s553_s21 }
  0x3e   :  { %216 = vmatpush1.bf16.msra.mxu0 %v669_v6  ;;  %v112_v30 = vrot.slane %v107_v27, %v884_v26  ;;  %v116_v63 = vrot.slane %v107_v27, %v115_v58  ;;  %s790_s22 = scalar_lea.vmem %s554_s21, 256  ;;  %p795_p7 = scmp.lt.s32.totalorder %s554_s21, %s554_s21 }
  0x3f   :  { %217 = vmatprep.subr.bf16.mxu0 %v670_v7  ;;  %v687_v7 = vld [vmem:[%s933_s5] sm:$0xff]   ;;  %p791_p6 = scmp.ne.s32.totalorder %s554_s21, %s790_s22  ;;  %p796_p8 = scmp.lt.s32.totalorder %s790_s22, %s790_s22 }
  0x41   :  { %p797_p9 = por %p796_p8, %p795_p7 }
  0x42   :  { %218 = vmatpush1.bf16.msra.mxu0 %v672_v8  ;;  %v887_v45 = vld [vmem:[#allocation2] sm:$0x1] }
  0x43   :  { %219 = vmatprep.subr.bf16.mxu0 %v673_v9  ;;  %p798_p10 = pnand %p797_p9, %p791_p6 }
  0x46   :  { %220 = vmatpush1.bf16.msra.mxu0 %v675_v10 }
  0x47   :  { %221 = vmatprep.subr.bf16.mxu0 %v676_v11 }
  0x4a   :  { %222 = vmatpush1.bf16.msra.mxu0 %v678_v12 }
  0x4b   :  { %223 = vmatprep.subr.bf16.mxu0 %v679_v13 }
  0x4e   :  { %224 = vmatpush1.bf16.msra.mxu0 %v681_v14  ;;  %v688_v14 = vld [vmem:[#allocation11 + $0x38] sm:$0xff]  }
  0x4f   :  { %225 = vmatprep.subr.bf16.mxu0 %v682_v15  ;;  %v689_v15 = vld [vmem:[#allocation11 + $0x30] sm:$0xff]  }
  0x52   :  { %226 = vmatpush1.bf16.msra.mxu0 %v684_v16  ;;  %v690_v16 = vld [vmem:[#allocation11 + $0x28] sm:$0xff]  }
  0x55   :  { %244 = vmatmul.mubr.bf16.vlgmr.msra.gmra.mxu0 %v685_v17  ;;  %v691_v17 = vld [vmem:[#allocation11 + $0x20] sm:$0xff]  }
  0x56   :  { %253 = vmatprep.mubr.bf16.mxu0 %v826_v0 }
  0x5d   :  { %254 = vmatmul.mubr.bf16.gmra.mxu0 %v686_v18  ;;  %v692_v18 = vld [vmem:[#allocation11 + $0x18] sm:$0xff]  }
 0x115   :  { %v245_v22 = vpop.f32.mrf.mxu0 }
 0x116   :  { %v246_v34 = vadd.f32 %v245_v22, %v112_v30  ;;  %v695_v22 = vld [vmem:[#allocation11] sm:$0xff]  }
 0x117   :  { %v247_v24 = vpop.f32.mrf.mxu0 }
 0x118   :  { %v248_v8 = vadd.f32 %v247_v24, %v116_v63 }
 0x119   :  { %v249_v25 = vpop.f32.mrf.mxu0 }
 0x11a   :  { %v250_v32 = vadd.f32 %v249_v25, %v112_v30 }
 0x11b   :  { %v251_v28 = vpop.f32.mrf.mxu0 }
 0x11c   :  { %v264_v37 = vmax.f32 %v246_v34, %v250_v32  ;;  %v252_v9 = vadd.f32 %v251_v28, %v116_v63 }
 0x11d   :  { %v255_v29 = vpop.f32.mrf.mxu0 }
 0x11e   :  { %v256_v35 = vadd.f32 %v255_v29, %v112_v30 }
 0x11f   :  { %v257_v31 = vpop.f32.mrf.mxu0 }
 0x120   :  { %v258_v2 = vadd.f32 %v257_v31, %v116_v63 }
 0x121   :  { %v259_v33 = vpop.f32.mrf.mxu0 }
 0x122   :  { %v260_v36 = vadd.f32 %v259_v33, %v112_v30 }
 0x123   :  { %v261_v61 = vpop.f32.mrf.mxu0 }
 0x124   :  { %v265_v38 = vmax.f32 %v256_v35, %v260_v36  ;;  %v262_v3 = vadd.f32 %v261_v61, %v116_v63 }
 0x126   :  { %v266_v39 = vmax.f32 %v264_v37, %v265_v38 }
 0x128   :  { %v267_v40 = vrot.slane %v266_v39, 4 }
 0x12a   :  { %v268_v41 = vmax.f32 %v266_v39, %v267_v40 }
 0x12c   :  { %v269_v42 = vrot.slane %v268_v41, 2 }
 0x12e   :  { %v270_v43 = vmax.f32 %v268_v41, %v269_v42 }
 0x130   :  { %v271_v44 = vrot.slane %v270_v43, 1 }
 0x132   :  { %v272_v46 = vmax.f32 %v270_v43, %v271_v44 }
 0x134   :  { %v890_v47 = vmax.f32 %v887_v45, %v272_v46 }
 0x136   :  { %v275_v48 = vsub.f32 %v887_v45, %v890_v47  ;;  %v282_v49 = vrot.slane %v890_v47, %v884_v26  ;;  %419 = vst [vmem:[#allocation2] sm:$0x1] %v890_v47  ;;  %v588_v45 = vld [vmem:[%s932_s4] ss:$0 sm:$0xff] }
 0x138   :  { %v284_v50 = vsub.f32 %v246_v34, %v282_v49  ;;  %v285_v51 = vsub.f32 %v250_v32, %v282_v49  ;;  %v286_v52 = vsub.f32 %v256_v35, %v282_v49  ;;  %v287_v53 = vsub.f32 %v260_v36, %v282_v49 }
 0x139   :  { %v276_v23 = vmul.f32 1.442695, %v275_v48 }
 0x13a   :  { %v292_v54 = vmul.f32 1.442695, %v286_v52  ;;  %v288_v55 = vmul.f32 1.442695, %v284_v50  ;;  %v294_v56 = vmul.f32 1.442695, %v287_v53 }
 0x13b   :  { %v290_v57 = vmul.f32 1.442695, %v285_v51 }
 0x13c   :  { %696 = vpow2.f32 %v292_v54 }
 0x13d   :  { %698 = vpow2.f32 %v294_v56 }
 0x13e   :  { %700 = vpow2.f32 %v288_v55 }
 0x13f   :  { %702 = vpow2.f32 %v290_v57 }
 0x140   :  { %704 = vpow2.f32 %v276_v23 }
 0x149   :  { %v697_v59 = vpop.eup %696 }
 0x14a   :  { %v699_v60 = vpop.eup %698  ;;  %v352_v4 = vmul.f32 %v697_v59, %v258_v2 }
 0x14b   :  { %v701_v62 = vpop.eup %700  ;;  %v299_v0 = vpack.c.bf16 %v699_v60, %v697_v59  ;;  %v353_v5 = vmul.f32 %v699_v60, %v262_v3 }
 0x14c   :  { %v703_v1 = vpop.eup %702  ;;  %v350_v11 = vmul.f32 %v701_v62, %v248_v8 }
 0x14d   :  { %613 = vmatpush3.bf16.msra.mxu1 %v299_v0  ;;  %v298_v6 = vpack.c.bf16 %v703_v1, %v701_v62  ;;  %v355_v10 = vpack.c.bf16 %v353_v5, %v352_v4  ;;  %v351_v12 = vmul.f32 %v703_v1, %v252_v9  ;;  %v705_v24 = vpop.eup %704 }
 0x14e   :  { %614 = vmatprep.subr.bf16.mxu1 %v828_v20  ;;  %v403_v25 = vrot.slane %v705_v24, %v884_v26 }
 0x14f   :  { %v354_v13 = vpack.c.bf16 %v351_v12, %v350_v11 }
 0x150   :  { %v405_v27 = vmul.f32 0.0, %v403_v25 }
 0x151   :  { %615 = vmatpush3.bf16.msra.mxu1 %v298_v6 }
 0x152   :  { %620 = vmatprep.subr.bf16.mxu1 %v828_v20 }
 0x154   :  { %617 = vmatmul.mubr.msk.bf16.vlgmr.msra.gmra.mxu1 %vm305_vm1, %v687_v7 }
 0x155   :  { %621 = vmatpush3.bf16.msra.mxu1 %v355_v10  ;;  %624 = vmatprep.mubr.msk.bf16.mxu1 %vm829_vm0, %v828_v20 }
 0x156   :  { %622 = vmatprep.subr.bf16.mxu1 %v828_v20 }
 0x159   :  { %623 = vmatpush3.bf16.msra.mxu1 %v354_v13 }
 0x15a   :  { %628 = vmatprep.subr.bf16.mxu1 %v828_v20 }
 0x15c   :  { %625 = vmatmul.mubr.msk.bf16.vlgmr.msra.gmra.mxu1 %vm305_vm1, %v687_v7 }
 0x15d   :  { %629 = vmatpush3.bf16.msra.mxu1 %v688_v14  ;;  %644 = vmatprep.mubr.msk.bf16.mxu1 %vm829_vm0, %v828_v20 }
 0x15e   :  { %630 = vmatprep.subr.bf16.mxu1 %v828_v20 }
 0x161   :  { %631 = vmatpush3.bf16.msra.mxu1 %v689_v15 }
 0x162   :  { %632 = vmatprep.subr.bf16.mxu1 %v828_v20 }
 0x165   :  { %633 = vmatpush3.bf16.msra.mxu1 %v690_v16 }
 0x166   :  { %634 = vmatprep.subr.bf16.mxu1 %v828_v20 }
 0x169   :  { %635 = vmatpush3.bf16.msra.mxu1 %v691_v17 }
 0x16a   :  { %636 = vmatprep.subr.bf16.mxu1 %v828_v20 }
 0x16d   :  { %637 = vmatpush3.bf16.msra.mxu1 %v692_v18 }
 0x16e   :  { %638 = vmatprep.subr.bf16.mxu1 %v828_v20 }
 0x171   :  { %639 = vmatpush3.bf16.msra.mxu1 %v693_v19 }
 0x172   :  { %640 = vmatprep.subr.bf16.mxu1 %v828_v20 }
 0x175   :  { %641 = vmatpush3.bf16.msra.mxu1 %v694_v21 }
 0x176   :  { %642 = vmatprep.subr.bf16.mxu1 %v828_v20 }
 0x179   :  { %643 = vmatpush3.bf16.msra.mxu1 %v695_v22 }
 0x214   :  { %v343_v28 = vpop.f32.mrf.mxu1 }
 0x215   :  { %v407_v29 = vadd.f32 %v405_v27, %v343_v28 }
 0x216   :  { %v618_v30 = vpop.f32.mrf.mxu1 }
 0x217   :  { %v425_v31 = vmax.f32 %v407_v29, 1e-30 }
 0x218   :  { %v346_v32 = vpop.f32.mrf.mxu1 }
 0x219   :  { %v408_v33 = vadd.f32 %v405_v27, %v346_v32  ;;  %706 = vrcp.f32 %v425_v31 }
 0x21a   :  { %v619_v34 = vpop.f32.mrf.mxu1 }
 0x21b   :  { %v426_v20 = vmax.f32 %v408_v33, 1e-30 }
 0x21c   :  { %v390_v35 = vpop.f32.mrf.mxu1 }
 0x21d   :  { %708 = vrcp.f32 %v426_v20  ;;  %v415_v40 = vadd.f32 %v405_v27, %v390_v35 }
 0x21e   :  { %v626_v36 = vpop.f32.mrf.mxu1 }
 0x220   :  { %v393_v37 = vpop.f32.mrf.mxu1 }
 0x221   :  { %v416_v41 = vadd.f32 %v405_v27, %v393_v37 }
 0x222   :  { %v627_v38 = vpop.f32.mrf.mxu1 }
 0x226   :  { %v707_v39 = vpop.eup %706 }
 0x227   :  { %v431_v26 = vmul.f32 %v707_v39, %v415_v40 }
 0x22a   :  { %v709_v42 = vpop.eup %708 }
 0x22b   :  { %v432_v43 = vmul.f32 %v709_v42, %v416_v41 }
 0x22d   :  { %v433_v44 = vpack.c.bf16 %v432_v43, %v431_v26 }
 0x22f   :  { %645 = vmatmul.mubr.bf16.vlgmr.msra.gmra.mxu1 %v433_v44 }
 0x2ef   :  { %v539_v46 = vpop.f32.mrf.mxu1 }
 0x2f0   :  { %v540_v47 = vadd.f32 %v588_v45, %v539_v46 }
 0x2f1   :  { %v646_v48 = vpop.f32.mrf.mxu1 }
 0x2f2   :  { %546 = vst [vmem:[#allocation13] sm:$0xff] %v540_v47 }
 0x2f3   :  { %v542_v49 = vpop.f32.mrf.mxu1 }
 0x2f4   :  { %v543_v50 = vadd.f32 %v588_v45, %v542_v49 }
 0x2f5   :  { %v647_v51 = vpop.f32.mrf.mxu1 }
 0x2f6   :  { %547 = vst [vmem:[#allocation13 + $0x8] sm:$0xff] %v543_v50 }
 0x2f7   :  { %801 = shalt.err (!%p798_p10)
}
 0x2f8   :  { %559 = dma.vmem_to_hbm [thread:$0]  %s554_s21, 256, %s934_s6, [#allocation7], %s819_s24, %s819_s24, %s820_s25  }
 0x2f9   :  { %816 = dma.done.wait [#allocation7], 256  }
 0x2fa   :  { %817 = vsyncadd [#allocation7], 4294967040 }
 0x2fb   :  { %563 = vsyncpa [#allocation6], 1 }
 0x2fc   :  { %564 = vsyncpa [#allocation9], 1 }
 0x2fd   :  { %565 = vsyncpa [#allocation12], 1 }
 0x2fe   :  { %566 = vsyncpa [#allocation7], 1 }

</bundles_post_ra>
